<compile_context>
chip_gen: v6e
topology: v6e:2x2x1
jax: 0.10.0
libtpu: 0.0.40
codegen_flags: <defaults>
</compile_context>

<pallas_src>
import jax
import jax.numpy as jnp
from jax.experimental import pallas as pl
from jax.experimental.pallas import tpu as pltpu

INPUT_SIZE = 10
HIDDEN_SIZE = 20
OUTPUT_SIZE = 1


def _round_up(x, m):
    return ((x + m - 1) // m) * m


def mlp_kernel(x_ref, w1_ref, b1_ref, w2r_ref, b2_ref, o_ref):
    # Layer 1: (TB, in) @ (in, hidden) on the MXU, f32 accumulate.
    h = jnp.dot(x_ref[...], w1_ref[...], preferred_element_type=jnp.float32)
    # Bias + ReLU in f32 on the VPU.
    h = jnp.maximum(h + b1_ref[...], 0.0)
    # Layer 2 (single output unit): VPU broadcast-multiply + lane reduction
    # instead of an N=1 MXU matmul.  w2r_ref is the weight row (1, hidden).
    y = jnp.sum(h * w2r_ref[...], axis=-1, keepdims=True) + b2_ref[...]
    o_ref[...] = y.astype(o_ref.dtype)


def neural_network_forward(x, w1, b1, w2, b2, *, block_b=1024,
                           use_bf16_inputs=False):
    """x: (B, INPUT_SIZE) f32 -> (B, OUTPUT_SIZE) f32.

    w1: (INPUT_SIZE, HIDDEN_SIZE), b1: (HIDDEN_SIZE,)
    w2: (HIDDEN_SIZE, OUTPUT_SIZE), b2: (OUTPUT_SIZE,)
    (i.e. the transpose of PyTorch's (out, in) convention, so y = x @ W + b.)
    """
    B, in_features = x.shape
    hidden = w1.shape[1]
    out_features = w2.shape[1]
    assert out_features == 1, "kernel specializes the single-output layer"

    # Batch tile: multiple of 8 sublanes, capped at block_b (itself rounded).
    block_b = _round_up(max(block_b, 8), 8)
    tb = min(block_b, _round_up(B, 8))
    padded_b = _round_up(B, tb)
    if padded_b != B:
        x = jnp.pad(x, ((0, padded_b - B), (0, 0)))

    if use_bf16_inputs:
        # Halves HBM traffic on the streamed input; accumulation stays f32.
        x = x.astype(jnp.bfloat16)
        w1 = w1.astype(jnp.bfloat16)

    # 2-D, TPU-friendly layouts for the small resident operands.
    b1_2d = b1.reshape(1, hidden)
    w2_row = w2.reshape(hidden, out_features).T.reshape(1, hidden)
    b2_2d = b2.reshape(1, out_features)

    grid = (padded_b // tb,)

    out = pl.pallas_call(
        mlp_kernel,
        out_shape=jax.ShapeDtypeStruct((padded_b, out_features), jnp.float32),
        grid=grid,
        in_specs=[
            # Streamed batch tile (double-buffered by the Pallas pipeline).
            pl.BlockSpec((tb, in_features), lambda i: (i, 0)),
            # Weights / biases: constant block index -> VMEM-resident.
            pl.BlockSpec((in_features, hidden), lambda i: (0, 0)),
            pl.BlockSpec((1, hidden), lambda i: (0, 0)),
            pl.BlockSpec((1, hidden), lambda i: (0, 0)),
            pl.BlockSpec((1, out_features), lambda i: (0, 0)),
        ],
        out_specs=pl.BlockSpec((tb, out_features), lambda i: (i, 0)),
        compiler_params=pltpu.CompilerParams(
            dimension_semantics=("parallel",)),
    )(x, w1, b1_2d, w2_row, b2_2d)

    return out[:B] if padded_b != B else out


def init_params(key):
    """Parameter init mirroring nn.Linear defaults (uniform +/- 1/sqrt(fan_in)).

    Weights stored transposed as (in, out) for the x @ W convention.
    """
    k1, k2, k3, k4 = jax.random.split(key, 4)
    bound1 = 1.0 / (INPUT_SIZE ** 0.5)
    bound2 = 1.0 / (HIDDEN_SIZE ** 0.5)
    w1 = jax.random.uniform(k1, (INPUT_SIZE, HIDDEN_SIZE), jnp.float32,
                            minval=-bound1, maxval=bound1)
    b1 = jax.random.uniform(k2, (HIDDEN_SIZE,), jnp.float32,
                            minval=-bound1, maxval=bound1)
    w2 = jax.random.uniform(k3, (HIDDEN_SIZE, OUTPUT_SIZE), jnp.float32,
                            minval=-bound2, maxval=bound2)
    b2 = jax.random.uniform(k4, (OUTPUT_SIZE,), jnp.float32,
                            minval=-bound2, maxval=bound2)
    return w1, b1, w2, b2


def _reference(x, w1, b1, w2, b2):
    return jnp.maximum(x @ w1 + b1, 0.0) @ w2 + b2


if __name__ == "__main__":
    key = jax.random.PRNGKey(0)
    k_x, k_x2, k_p = jax.random.split(key, 3)
    w1, b1, w2, b2 = init_params(k_p)

    # Case 1: small batch, single grid step.
    batch = 8
    x = jax.random.normal(k_x, (batch, INPUT_SIZE), jnp.float32)
    out = jax.block_until_ready(neural_network_forward(x, w1, b1, w2, b2))
    ref = _reference(x, w1, b1, w2, b2)
    assert out.shape == (batch, OUTPUT_SIZE)
    assert jnp.allclose(out, ref, atol=1e-5, rtol=1e-5)

    # Case 2: ragged batch exercising the batch grid + padding path
    # (small block_b just to force multiple grid steps in this demo).
    batch2 = 50
    x2 = jax.random.normal(k_x2, (batch2, INPUT_SIZE), jnp.float32)
    out2 = jax.block_until_ready(
        neural_network_forward(x2, w1, b1, w2, b2, block_b=16))
    ref2 = _reference(x2, w1, b1, w2, b2)
    assert out2.shape == (batch2, OUTPUT_SIZE)
    assert jnp.allclose(out2, ref2, atol=1e-5, rtol=1e-5)

    print("KERNEL_OK")
</pallas_src>

<mosaic_0001>
module attributes {stable_mosaic.version = 11 : i64} {
  func.func @mlp_kernel(%arg0: i32, %arg1: memref<8x10xf32, #tpu.memory_space<vmem>>, %arg2: memref<10x20xf32, #tpu.memory_space<vmem>>, %arg3: memref<1x20xf32, #tpu.memory_space<vmem>>, %arg4: memref<1x20xf32, #tpu.memory_space<vmem>>, %arg5: memref<1x1xf32, #tpu.memory_space<vmem>>, %arg6: memref<8x1xf32, #tpu.memory_space<vmem>>) attributes {dimension_semantics = [#tpu.dimension_semantics<parallel>], iteration_bounds = array<i64: 1>, scalar_prefetch = 0 : i64, scratch_operands = 0 : i64, tpu.core_type = #tpu.core_type<tc>, window_params = [{transform_indices = @transform_0, window_bounds = array<i64: 8, 10>}, {pipeline_mode = #tpu.pipeline_mode<synchronous>, transform_indices = @transform_1, window_bounds = array<i64: 10, 20>}, {pipeline_mode = #tpu.pipeline_mode<synchronous>, transform_indices = @transform_2, window_bounds = array<i64: 1, 20>}, {pipeline_mode = #tpu.pipeline_mode<synchronous>, transform_indices = @transform_3, window_bounds = array<i64: 1, 20>}, {pipeline_mode = #tpu.pipeline_mode<synchronous>, transform_indices = @transform_4, window_bounds = array<i64: 1, 1>}, {transform_indices = @transform_5, window_bounds = array<i64: 8, 1>}]} {
    %c0 = arith.constant 0 : index
    %c0_0 = arith.constant 0 : index
    %0 = vector.load %arg1[%c0, %c0_0] : memref<8x10xf32, #tpu.memory_space<vmem>>, vector<8x10xf32>
    %c0_1 = arith.constant 0 : index
    %c0_2 = arith.constant 0 : index
    %1 = vector.load %arg2[%c0_1, %c0_2] : memref<10x20xf32, #tpu.memory_space<vmem>>, vector<10x20xf32>
    %cst = arith.constant dense<0.000000e+00> : vector<8x20xf32>
    %2 = tpu.matmul %0, %1, %cst {dimension_numbers = #tpu.dot_dimension_numbers<[1], [0], [0], [1], [0, 0, 1, 1], [], []>} : vector<8x10xf32>, vector<10x20xf32>, vector<8x20xf32> -> vector<8x20xf32>
    %c0_3 = arith.constant 0 : index
    %c0_4 = arith.constant 0 : index
    %3 = vector.load %arg3[%c0_3, %c0_4] : memref<1x20xf32, #tpu.memory_space<vmem>>, vector<1x20xf32>
    %4 = vector.broadcast %3 : vector<1x20xf32> to vector<8x20xf32>
    %5 = arith.addf %2, %4 : vector<8x20xf32>
    %cst_5 = arith.constant 0.000000e+00 : f32
    %6 = vector.broadcast %cst_5 : f32 to vector<8x20xf32>
    %7 = arith.maximumf %5, %6 : vector<8x20xf32>
    %c0_6 = arith.constant 0 : index
    %c0_7 = arith.constant 0 : index
    %8 = vector.load %arg4[%c0_6, %c0_7] : memref<1x20xf32, #tpu.memory_space<vmem>>, vector<1x20xf32>
    %9 = vector.broadcast %8 : vector<1x20xf32> to vector<8x20xf32>
    %10 = arith.mulf %7, %9 : vector<8x20xf32>
    %cst_8 = arith.constant dense<0.000000e+00> : vector<8xf32>
    %11 = vector.multi_reduction <add>, %10, %cst_8 [1] : vector<8x20xf32> to vector<8xf32>
    %12 = vector.shape_cast %11 : vector<8xf32> to vector<8x1xf32>
    %c0_9 = arith.constant 0 : index
    %c0_10 = arith.constant 0 : index
    %13 = vector.load %arg5[%c0_9, %c0_10] : memref<1x1xf32, #tpu.memory_space<vmem>>, vector<1x1xf32>
    %14 = vector.broadcast %13 : vector<1x1xf32> to vector<8x1xf32>
    %15 = arith.addf %12, %14 : vector<8x1xf32>
    %c0_11 = arith.constant 0 : index
    %c0_12 = arith.constant 0 : index
    %16 = vector.load %arg6[%c0_11, %c0_12] : memref<8x1xf32, #tpu.memory_space<vmem>>, vector<8x1xf32>
    tpu.vector_store %arg6[%c0_11, %c0_12], %15 {strides = array<i32>} : memref<8x1xf32, #tpu.memory_space<vmem>>, vector<8x1xf32>,
    return
  }
  func.func @transform_0(%arg0: i32) -> (i32, i32) {
    %c0_i32 = arith.constant 0 : i32
    %c0_i32_0 = arith.constant 0 : i32
    return %arg0, %c0_i32 : i32, i32
  }
  func.func @transform_1(%arg0: i32) -> (i32, i32) {
    %c0_i32 = arith.constant 0 : i32
    %c0_i32_0 = arith.constant 0 : i32
    %c0_i32_1 = arith.constant 0 : i32
    return %c0_i32, %c0_i32_0 : i32, i32
  }
  func.func @transform_2(%arg0: i32) -> (i32, i32) {
    %c0_i32 = arith.constant 0 : i32
    %c0_i32_0 = arith.constant 0 : i32
    %c0_i32_1 = arith.constant 0 : i32
    return %c0_i32, %c0_i32_0 : i32, i32
  }
  func.func @transform_3(%arg0: i32) -> (i32, i32) {
    %c0_i32 = arith.constant 0 : i32
    %c0_i32_0 = arith.constant 0 : i32
    %c0_i32_1 = arith.constant 0 : i32
    return %c0_i32, %c0_i32_0 : i32, i32
  }
  func.func @transform_4(%arg0: i32) -> (i32, i32) {
    %c0_i32 = arith.constant 0 : i32
    %c0_i32_0 = arith.constant 0 : i32
    %c0_i32_1 = arith.constant 0 : i32
    return %c0_i32, %c0_i32_0 : i32, i32
  }
  func.func @transform_5(%arg0: i32) -> (i32, i32) {
    %c0_i32 = arith.constant 0 : i32
    %c0_i32_0 = arith.constant 0 : i32
    return %arg0, %c0_i32 : i32, i32
  }
}

</mosaic_0001>

<bundles_post_ra>
// kernel: tpu_custom_call.1
= control target key start
LH: loop header
LB: loop body
LE: loop exit
PB: predicated region body
PF: predicated region fallthrough
CT: control target
= control target key end

     0   :  { %s284_s0 = inlined_call_operand.hbm [shape: f32[8,10], index: 0, kind: input, shape index: {}]   ;;  %s285_s1 = inlined_call_operand.hbm [shape: f32[10,20], index: 1, kind: input, shape index: {}]   ;;  %s286_s2 = inlined_call_operand.vmem [shape: f32[1,20], index: 2, kind: input, shape index: {}]   ;;  %s287_s3 = inlined_call_operand.vmem [shape: f32[1,20], index: 3, kind: input, shape index: {}]   ;;  %s288_s4 = inlined_call_operand.<no memory space> [shape: f32[1,1], index: 4, kind: input, shape index: {}]   ;;  %s289_s5 = inlined_call_operand.vmem [shape: f32[8,1], index: 5, kind: output, shape index: {}]  }
   0x1   :  { %v10_v0 = vstv %s288_s4 }
   0x2   :  { %11 = vst [vmem:[#allocation2] sm:$0x1] %v10_v0 }
   0x3   :  { %12 = vsyncpa [#allocation4], 0 }
   0x4   :  { %13 = vsyncpa [#allocation6], 0  ;;  %s230_s20 = smov [#allocation3]   ;;  %s231_s22 = smov [#allocation5]  }
   0x5   :  { %s20_s21 = sshll.u32 %s230_s20, 4  ;;  %s29_s23 = sshll.u32 %s231_s22, 4  ;;  %s21_s21 = int_to_ptr.vmem [resolvable:$true] %s20_s21  ;;  %s30_s23 = int_to_ptr.vmem [resolvable:$true] %s29_s23 }
   0x6   :  { %s194_s24 = scalar_lea.vmem %s21_s21, 128  ;;  %p199_p1 = scmp.lt.s32.totalorder %s21_s21, %s21_s21 }
   0x7   :  { %p195_p0 = scmp.ne.s32.totalorder %s21_s21, %s194_s24  ;;  %p200_p2 = scmp.lt.s32.totalorder %s194_s24, %s194_s24 }
   0x9   :  { %p201_p3 = por %p200_p2, %p199_p1 }
   0xb   :  { %p202_p4 = pnand %p201_p3, %p195_p0 }
   0xd   :  { %205 = shalt.err (!%p202_p4)
}
   0xe   :  { %23 = dma.hbm_to_vmem [thread:$0]  %s284_s0, 128, %s21_s21, [#allocation4]  }
   0xf   :  { %s214_s4 = scalar_lea.vmem %s30_s23, 256  ;;  %p219_p6 = scmp.lt.s32.totalorder %s30_s23, %s30_s23 }
  0x10   :  { %p215_p5 = scmp.ne.s32.totalorder %s30_s23, %s214_s4  ;;  %p220_p7 = scmp.lt.s32.totalorder %s214_s4, %s214_s4 }
  0x12   :  { %p221_p8 = por %p220_p7, %p219_p6 }
  0x14   :  { %p222_p9 = pnand %p221_p8, %p215_p5 }
  0x16   :  { %225 = shalt.err (!%p222_p9)
}
  0x17   :  { %s232_s27 = smov 128   ;;  %s233_s28 = smov 8  }
  0x18   :  { %35 = dma.hbm_to_vmem [thread:$0]  %s285_s1, 256, %s30_s23, [#allocation6], %s232_s27, %s232_s27, %s233_s28  }
  0x19   :  { %226 = dma.done.wait [#allocation4], 128  }
  0x1a   :  { %227 = vsyncadd [#allocation4], 4294967168 }
  0x1b   :  { %228 = dma.done.wait [#allocation6], 256  }
  0x1c   :  { %229 = vsyncadd [#allocation6], 4294967040  ;;  %v234_v1 = vmov 0.0   ;;  %vm235_vm0 = vmmov 0   ;;  %vm62_vm1 = vcmask 1041408   ;;  %v49_v3 = vld [vmem:[#allocation5] sm:$0xff] }
  0x1d   :  { %173 = vmatprep.subr.mxu0 %v234_v1  ;;  %177 = vmatprep.mubr.msk.f32.mxu0 %vm235_vm0, %v234_v1  ;;  %v50_v2 = vld [vmem:[#allocation5 + $0x8] sm:$0x3]  ;;  %v48_v4 = vld [vmem:[#allocation3] sm:$0xff]  ;;  %vm58_vm2 = vcmask 80896   ;;  %v165_v5 = vld [vmem:[%s286_s2] ss:$0 sm:$0xff] }
  0x1e   :  { %174 = vmatpush3.msk.msra.mxu0 %vm62_vm1, %v50_v2  ;;  %v168_v9 = vld [vmem:[%s287_s3] ss:$0 sm:$0xff]  ;;  %vm145_vm3 = vcmask 162816   ;;  %vm157_vm4 = vcmask 7168  }
  0x1f   :  { %175 = vmatprep.subr.mxu0 %v234_v1  ;;  %v169_v13 = vld [vmem:[#allocation2] ss:$0 sm:$0xff] }
  0x20   :  { %176 = vmatpush3.msra.mxu0 %v49_v3 }
  0x21   :  { %178 = vmatmul.mubr.msk.f32.vlgmr.msra.gmra.mxu0 %vm58_vm2, %v48_v4 }
  0xe1   :  { %v132_v6 = vpop.f32.mrf.mxu0 }
  0xe2   :  { %v133_v7 = vadd.f32 %v165_v5, %v132_v6 }
  0xe3   :  { %v179_v8 = vpop.f32.mrf.mxu0 }
  0xe4   :  { %v136_v10 = vmax.f32 %v133_v7, 0.0 }
  0xe6   :  { %v144_v11 = vmul.f32 %v168_v9, %v136_v10 }
  0xe8   :  { %v146_v12 = vsel %vm145_vm3, %v144_v11, 0.0 }
  0xe9   :  { %147 = vadd.xlane.f32.xlu0 %v146_v12 }
 0x172   :  { %v148_v14 = vpop.xlane.xlu0 %147 }
 0x173   :  { %v156_v15 = vadd.f32 %v169_v13, %v148_v14 }
 0x175   :  { %158 = vst.msk [vmem:[%s289_s5] sm:$0xff] %vm157_vm4, %v156_v15 }
 0x176   :  { %163 = vsyncpa [#allocation4], 1 }
 0x177   :  { %164 = vsyncpa [#allocation6], 1 }

</bundles_post_ra>
